<compile_context>
chip_gen: v7x
topology: tpu7x:2x2x1
jax: 0.10.0
libtpu: 0.0.40
codegen_flags: <defaults>
</compile_context>

<pallas_src>
import jax
import jax.numpy as jnp
import numpy as np
from jax.experimental import pallas as pl
from jax.experimental.pallas import tpu as pltpu


def _round_up(x, m):
    return (x + m - 1) // m * m


def _choose_tile_b(B, L, itemsize,
                   target_block_bytes=2 << 20, vmem_budget=40 << 20):
    """Pick tile_b from a bandwidth target and a VMEM-fit bound (dtype-aware)."""
    # ~2 MiB input blocks reach >=85% of HBM roofline; per-step overhead
    # (~0.35us) is well amortized.
    tb_bw = max(8, target_block_bytes // (L * itemsize))
    # VMEM fit per row: 2 inputs x 2 pipeline buffers x itemsize*L
    # + ~8 full-tile f32 temporaries (p/t/bce/valid/pb/... materialized by
    # Mosaic) + lengths block padded to 128 lanes, double-buffered.
    per_row = 2 * 2 * L * itemsize + 8 * L * 4 + 2 * 512
    tb_vmem = max(8, vmem_budget // per_row)
    tb = min(tb_bw, tb_vmem)
    # Never larger than the (sublane-rounded) batch.
    tb = min(tb, _round_up(B, 8))
    # v7x megacore: prefer >= 2 grid tiles so both TensorCores get work.
    if B > 8:
        tb = min(tb, max(8, _round_up(-(-B // 2), 8)))
    return max(8, (tb // 8) * 8)


def _make_jagged_loss_kernel(tile_b, L, B, decisive_confidence, binary_truth):
    def kernel(pred_ref, truth_ref, len_ref, part_ref):
        p = pred_ref[...].astype(jnp.float32)      # [tile_b, L]
        t = truth_ref[...].astype(jnp.float32)     # [tile_b, L]
        lens = len_ref[...]                        # [tile_b, 1] int32

        # Tail-row mask from program_id and the static B.  Out-of-bounds rows
        # of the last block (pred/truth/lengths) hold unspecified values, so
        # the mask must NOT depend on `lens` there.
        row0 = pl.program_id(0) * tile_b
        row = jax.lax.broadcasted_iota(jnp.int32, (tile_b, 1), 0) + row0
        row_ok = row < B

        # torch.where(isnan|isinf(pred), 0, pred) -> single compare + select.
        # (abs(NaN) < inf is False, so NaN and +/-inf both map to 0.)
        p = jnp.where(jnp.abs(p) < jnp.inf, p, 0.0)

        # validity mask for the jagged rows (truth_i[:len(pred_i)] truncation)
        col = jax.lax.broadcasted_iota(jnp.int32, (tile_b, L), 1)
        valid = (col < lens) & row_ok
        validf = valid.astype(jnp.float32)

        if binary_truth:
            # one log instead of two; exact for t in {0,1} incl. the -100 clamp
            q = jnp.where(t > 0.0, p, 1.0 - p)
            bce = -jnp.maximum(jnp.log(q), -100.0)
        else:
            # general (soft-label) BCE, log clamped at -100 like PyTorch
            logp = jnp.maximum(jnp.log(p), -100.0)
            log1mp = jnp.maximum(jnp.log(1.0 - p), -100.0)
            bce = -(t * logp + (1.0 - t) * log1mp)
        bce = jnp.where(valid, bce, 0.0)

        # per-row mean BCE; counts come analytically from lengths
        row_count = jnp.where(row_ok, jnp.clip(lens, 0, L), 0).astype(jnp.float32)
        row_sum = jnp.sum(bce, axis=1, keepdims=True)          # [tile_b, 1]
        row_mean = row_sum / jnp.maximum(row_count, 1.0)       # empty row -> 0
        loss_sum = jnp.sum(row_mean)

        # confusion stats over the valid region.  tn derived arithmetically:
        #   tn = #(pred<=thr & truth<=0 & valid) = valid - pp - gp + tp
        pb = (p > decisive_confidence).astype(jnp.float32)
        tbv = (t > 0.0).astype(jnp.float32) * validf
        tp = jnp.sum(pb * tbv)
        gp = jnp.sum(tbv)
        pp = jnp.sum(pb * validf)
        valid_total = jnp.sum(row_count)
        tn = valid_total - pp - gp + tp

        # lane-dense (8, 128) partial-stats tile: stats in sublane 0, lanes 0..4
        lane = jax.lax.broadcasted_iota(jnp.int32, (8, 128), 1)
        sub = jax.lax.broadcasted_iota(jnp.int32, (8, 128), 0)
        vals = jnp.where(lane == 0, loss_sum,
               jnp.where(lane == 1, tp,
               jnp.where(lane == 2, tn,
               jnp.where(lane == 3, gp,
               jnp.where(lane == 4, valid_total, 0.0)))))
        part_ref[...] = jnp.where(sub == 0, vals, 0.0)

    return kernel


def jagged_loss(pred, truth, lengths, decisive_confidence=0.5,
                binary_truth=False, tile_b=None):
    """Pallas TPU implementation of JaggedLoss.forward.

    pred, truth: [B, L] float32/bfloat16 (padded); lengths: [B] or [B,1] int32.
    Returns (loss, accuracy) scalars.
    """
    B, L = pred.shape
    lengths = jnp.asarray(lengths, jnp.int32).reshape(B, 1)
    itemsize = jnp.dtype(pred.dtype).itemsize

    if tile_b is None:
        tile_b = _choose_tile_b(B, L, itemsize)
    tile_b = max(8, (tile_b // 8) * 8)
    num_tiles = pl.cdiv(B, tile_b)   # no padding: tail block masked in-kernel

    kernel = _make_jagged_loss_kernel(tile_b, L, B, float(decisive_confidence),
                                      bool(binary_truth))

    # Right-size the VMEM request from actual usage (double-buffered inputs +
    # in-kernel f32 temporaries + lane-padded lengths block + output/slack).
    est_vmem = (2 * 2 * tile_b * L * itemsize
                + 8 * tile_b * L * 4
                + 2 * tile_b * 512
                + (2 << 20))
    vmem_limit = int(min(max(est_vmem, 16 << 20), 60 << 20))

    parts = pl.pallas_call(
        kernel,
        out_shape=jax.ShapeDtypeStruct((num_tiles * 8, 128), jnp.float32),
        grid=(num_tiles,),
        in_specs=[pl.BlockSpec((tile_b, L), lambda i: (i, 0)),
                  pl.BlockSpec((tile_b, L), lambda i: (i, 0)),
                  pl.BlockSpec((tile_b, 1), lambda i: (i, 0))],
        out_specs=pl.BlockSpec((8, 128), lambda i: (i, 0)),
        compiler_params=pltpu.CompilerParams(
            dimension_semantics=("parallel",),
            vmem_limit_bytes=vmem_limit),
    )(pred, truth, lengths)

    # tiny epilogue in plain JAX: reduce per-tile partials and finalize
    totals = jnp.sum(parts.reshape(num_tiles, 8, 128)[:, 0, :], axis=0)
    loss_sum, tp, tn, gp, valid_total = (totals[0], totals[1], totals[2],
                                         totals[3], totals[4])

    loss = loss_sum / float(B)                 # loss /= len(pred)
    gn = valid_total - gp
    gp = jnp.maximum(gp, 1.0)                  # max(ground_positive, 1)
    gn = jnp.maximum(gn, 1.0)                  # max(ground_negative, 1)
    accuracy = (tp / gp) * (tn / gn)
    return loss, accuracy

    # TODO(synk): for heavily jagged data, add an "arbitrary" L-tile grid axis
    # with scalar-prefetched per-tile max lengths (PrefetchScalarGridSpec) and
    # pl.when / manual DMA so fully-padded column tiles are neither read from
    # HBM nor run through the log path.


def jagged_loss_ref(pred, truth, lengths, decisive_confidence=0.5):
    """Pure-numpy reference replicating the PyTorch loop exactly."""
    pred = np.asarray(pred, np.float64)
    truth = np.asarray(truth, np.float64)
    lengths = np.asarray(lengths).reshape(-1)
    B = pred.shape[0]
    loss = 0.0
    gp = gn = tp = tn = 0
    for i in range(B):
        n = int(lengths[i])
        if n == 0:
            continue
        p = pred[i, :n].copy()
        p[np.isnan(p)] = 0.0
        p[np.isinf(p)] = 0.0
        t = truth[i, :n]
        logp = np.maximum(np.log(np.where(p > 0, p, 1e-300)), -100.0)
        log1mp = np.maximum(np.log(np.where(p < 1, 1 - p, 1e-300)), -100.0)
        loss += np.mean(-(t * logp + (1 - t) * log1mp))
        pb = p > decisive_confidence
        tb = t > 0
        gp += int(tb.sum()); gn += int((~tb).sum())
        tp += int((pb & tb).sum()); tn += int((~pb & ~tb).sum())
    loss /= B
    gp = max(gp, 1); gn = max(gn, 1)
    return loss, (tp / gp) * (tn / gn)


if __name__ == "__main__":
    key = jax.random.PRNGKey(0)
    B, L = 20, 256
    k1, k2, k3 = jax.random.split(key, 3)
    # predictions in (0, 1) via sigmoid, truth in {0, 1}
    pred = jax.nn.sigmoid(jax.random.normal(k1, (B, L), jnp.float32))
    truth = (jax.random.uniform(k2, (B, L)) > 0.5).astype(jnp.float32)
    # jagged lengths, including an empty row (skipped in the loop) and a full row
    lengths = jax.random.randint(k3, (B,), 0, L + 1, dtype=jnp.int32)
    lengths = lengths.at[0].set(L)
    lengths = lengths.at[2].set(0)
    # exercise the NaN / Inf cleanup path
    pred = pred.at[0, 3].set(jnp.nan)
    pred = pred.at[1, 10].set(jnp.inf)

    # auto tile_b (=16 here -> 2 tiles, B=20 not a multiple -> tail masking
    # path exercised), forced tile_b=8 (3 tiles), and the one-log binary path.
    fn_auto = jax.jit(lambda p, t, l: jagged_loss(p, t, l))
    fn_small = jax.jit(lambda p, t, l: jagged_loss(p, t, l, tile_b=8))
    fn_bin = jax.jit(lambda p, t, l: jagged_loss(p, t, l, binary_truth=True))

    results = [fn_auto(pred, truth, lengths),
               fn_small(pred, truth, lengths),
               fn_bin(pred, truth, lengths)]
    jax.block_until_ready(results)

    ref_loss, ref_acc = jagged_loss_ref(np.array(pred), np.array(truth),
                                        np.array(lengths))
    for lo, ac in results:
        assert np.allclose(float(lo), ref_loss, rtol=1e-4, atol=1e-4), (lo, ref_loss)
        assert np.allclose(float(ac), ref_acc, rtol=1e-4, atol=1e-4), (ac, ref_acc)
    print("KERNEL_OK")
</pallas_src>

<mosaic_0001>
module attributes {stable_mosaic.version = 11 : i64} {
  func.func @kernel(%arg0: i32, %arg1: memref<16x256xf32, #tpu.memory_space<vmem>>, %arg2: memref<16x256xf32, #tpu.memory_space<vmem>>, %arg3: memref<16x1xi32, #tpu.memory_space<vmem>>, %arg4: memref<8x128xf32, #tpu.memory_space<vmem>>) attributes {dimension_semantics = [#tpu.dimension_semantics<parallel>], iteration_bounds = array<i64: 2>, scalar_prefetch = 0 : i64, scratch_operands = 0 : i64, tpu.core_type = #tpu.core_type<tc>, window_params = [{transform_indices = @transform_0, window_bounds = array<i64: 16, 256>}, {transform_indices = @transform_1, window_bounds = array<i64: 16, 256>}, {transform_indices = @transform_2, window_bounds = array<i64: 16, 1>}, {transform_indices = @transform_3, window_bounds = array<i64: 8, 128>}]} {
    %c0 = arith.constant 0 : index
    %c0_0 = arith.constant 0 : index
    %0 = vector.load %arg1[%c0, %c0_0] : memref<16x256xf32, #tpu.memory_space<vmem>>, vector<16x256xf32>
    %c0_1 = arith.constant 0 : index
    %c0_2 = arith.constant 0 : index
    %1 = vector.load %arg2[%c0_1, %c0_2] : memref<16x256xf32, #tpu.memory_space<vmem>>, vector<16x256xf32>
    %c0_3 = arith.constant 0 : index
    %c0_4 = arith.constant 0 : index
    %2 = vector.load %arg3[%c0_3, %c0_4] : memref<16x1xi32, #tpu.memory_space<vmem>>, vector<16x1xi32>
    %c16_i32 = arith.constant 16 : i32
    %3 = arith.muli %arg0, %c16_i32 : i32
    %4 = tpu.iota {dimensions = array<i32: 0>} : vector<16x1xi32>
    %5 = vector.broadcast %3 : i32 to vector<16x1xi32>
    %6 = arith.addi %4, %5 : vector<16x1xi32>
    %c20_i32 = arith.constant 20 : i32
    %7 = vector.broadcast %c20_i32 : i32 to vector<16x1xi32>
    %8 = arith.cmpi slt, %6, %7 : vector<16x1xi32>
    %9 = math.absf %0 : vector<16x256xf32>
    %cst = arith.constant 0x7F800000 : f32
    %10 = vector.broadcast %cst : f32 to vector<16x256xf32>
    %11 = arith.cmpf olt, %9, %10 : vector<16x256xf32>
    %cst_5 = arith.constant 0.000000e+00 : f32
    %12 = vector.broadcast %cst_5 : f32 to vector<16x256xf32>
    %13 = arith.select %11, %0, %12 : vector<16x256xi1>, vector<16x256xf32>
    %14 = tpu.iota {dimensions = array<i32: 1>} : vector<16x256xi32>
    %15 = vector.broadcast %2 : vector<16x1xi32> to vector<16x256xi32>
    %16 = arith.cmpi slt, %14, %15 : vector<16x256xi32>
    %17 = vector.broadcast %8 : vector<16x1xi1> to vector<16x256xi1>
    %18 = arith.andi %16, %17 : vector<16x256xi1>
    %19 = arith.extui %18 : vector<16x256xi1> to vector<16x256xi32>
    %20 = arith.sitofp %19 : vector<16x256xi32> to vector<16x256xf32>
    %21 = math.log %13 : vector<16x256xf32>
    %cst_6 = arith.constant -1.000000e+02 : f32
    %22 = vector.broadcast %cst_6 : f32 to vector<16x256xf32>
    %23 = arith.maximumf %21, %22 : vector<16x256xf32>
    %cst_7 = arith.constant 1.000000e+00 : f32
    %24 = vector.broadcast %cst_7 : f32 to vector<16x256xf32>
    %25 = arith.subf %24, %13 : vector<16x256xf32>
    %26 = math.log %25 : vector<16x256xf32>
    %cst_8 = arith.constant -1.000000e+02 : f32
    %27 = vector.broadcast %cst_8 : f32 to vector<16x256xf32>
    %28 = arith.maximumf %26, %27 : vector<16x256xf32>
    %29 = arith.mulf %1, %23 : vector<16x256xf32>
    %cst_9 = arith.constant 1.000000e+00 : f32
    %30 = vector.broadcast %cst_9 : f32 to vector<16x256xf32>
    %31 = arith.subf %30, %1 : vector<16x256xf32>
    %32 = arith.mulf %31, %28 : vector<16x256xf32>
    %33 = arith.addf %29, %32 : vector<16x256xf32>
    %cst_10 = arith.constant 0.000000e+00 : f32
    %34 = vector.broadcast %cst_10 : f32 to vector<16x256xf32>
    %35 = arith.subf %34, %33 : vector<16x256xf32>
    %cst_11 = arith.constant 0.000000e+00 : f32
    %36 = vector.broadcast %cst_11 : f32 to vector<16x256xf32>
    %37 = arith.select %18, %35, %36 : vector<16x256xi1>, vector<16x256xf32>
    %c0_i32 = arith.constant 0 : i32
    %c256_i32 = arith.constant 256 : i32
    %38 = vector.broadcast %c0_i32 : i32 to vector<16x1xi32>
    %39 = arith.maxsi %38, %2 : vector<16x1xi32>
    %40 = vector.broadcast %c256_i32 : i32 to vector<16x1xi32>
    %41 = arith.minsi %40, %39 : vector<16x1xi32>
    %c0_i32_12 = arith.constant 0 : i32
    %42 = vector.broadcast %c0_i32_12 : i32 to vector<16x1xi32>
    %43 = arith.select %8, %41, %42 : vector<16x1xi1>, vector<16x1xi32>
    %44 = arith.sitofp %43 : vector<16x1xi32> to vector<16x1xf32>
    %cst_13 = arith.constant dense<0.000000e+00> : vector<16xf32>
    %45 = vector.multi_reduction <add>, %37, %cst_13 [1] : vector<16x256xf32> to vector<16xf32>
    %46 = vector.shape_cast %45 : vector<16xf32> to vector<16x1xf32>
    %cst_14 = arith.constant 1.000000e+00 : f32
    %47 = vector.broadcast %cst_14 : f32 to vector<16x1xf32>
    %48 = arith.maximumf %44, %47 : vector<16x1xf32>
    %49 = arith.divf %46, %48 : vector<16x1xf32>
    %50 = vector.shape_cast %49 : vector<16x1xf32> to vector<1x16x1xf32>
    %cst_15 = arith.constant dense<0.000000e+00> : vector<1xf32>
    %51 = vector.multi_reduction <add>, %50, %cst_15 [1, 2] : vector<1x16x1xf32> to vector<1xf32>
    %52 = vector.shape_cast %51 : vector<1xf32> to vector<1x1x1xf32>
    %53 = vector.extract %52[0, 0, 0] : f32 from vector<1x1x1xf32>
    %cst_16 = arith.constant 5.000000e-01 : f32
    %54 = vector.broadcast %cst_16 : f32 to vector<16x256xf32>
    %55 = arith.cmpf ogt, %13, %54 : vector<16x256xf32>
    %56 = arith.extui %55 : vector<16x256xi1> to vector<16x256xi32>
    %57 = arith.sitofp %56 : vector<16x256xi32> to vector<16x256xf32>
    %cst_17 = arith.constant 0.000000e+00 : f32
    %58 = vector.broadcast %cst_17 : f32 to vector<16x256xf32>
    %59 = arith.cmpf ogt, %1, %58 : vector<16x256xf32>
    %60 = arith.extui %59 : vector<16x256xi1> to vector<16x256xi32>
    %61 = arith.sitofp %60 : vector<16x256xi32> to vector<16x256xf32>
    %62 = arith.mulf %61, %20 : vector<16x256xf32>
    %63 = arith.mulf %57, %62 : vector<16x256xf32>
    %64 = vector.shape_cast %63 : vector<16x256xf32> to vector<1x16x256xf32>
    %cst_18 = arith.constant dense<0.000000e+00> : vector<1xf32>
    %65 = vector.multi_reduction <add>, %64, %cst_18 [1, 2] : vector<1x16x256xf32> to vector<1xf32>
    %66 = vector.shape_cast %65 : vector<1xf32> to vector<1x1x1xf32>
    %67 = vector.extract %66[0, 0, 0] : f32 from vector<1x1x1xf32>
    %68 = vector.shape_cast %62 : vector<16x256xf32> to vector<1x16x256xf32>
    %cst_19 = arith.constant dense<0.000000e+00> : vector<1xf32>
    %69 = vector.multi_reduction <add>, %68, %cst_19 [1, 2] : vector<1x16x256xf32> to vector<1xf32>
    %70 = vector.shape_cast %69 : vector<1xf32> to vector<1x1x1xf32>
    %71 = vector.extract %70[0, 0, 0] : f32 from vector<1x1x1xf32>
    %72 = arith.mulf %57, %20 : vector<16x256xf32>
    %73 = vector.shape_cast %72 : vector<16x256xf32> to vector<1x16x256xf32>
    %cst_20 = arith.constant dense<0.000000e+00> : vector<1xf32>
    %74 = vector.multi_reduction <add>, %73, %cst_20 [1, 2] : vector<1x16x256xf32> to vector<1xf32>
    %75 = vector.shape_cast %74 : vector<1xf32> to vector<1x1x1xf32>
    %76 = vector.extract %75[0, 0, 0] : f32 from vector<1x1x1xf32>
    %77 = vector.shape_cast %44 : vector<16x1xf32> to vector<1x16x1xf32>
    %cst_21 = arith.constant dense<0.000000e+00> : vector<1xf32>
    %78 = vector.multi_reduction <add>, %77, %cst_21 [1, 2] : vector<1x16x1xf32> to vector<1xf32>
    %79 = vector.shape_cast %78 : vector<1xf32> to vector<1x1x1xf32>
    %80 = vector.extract %79[0, 0, 0] : f32 from vector<1x1x1xf32>
    %81 = arith.subf %80, %76 : f32
    %82 = arith.subf %81, %71 : f32
    %83 = arith.addf %82, %67 : f32
    %84 = tpu.iota {dimensions = array<i32: 1>} : vector<8x128xi32>
    %85 = tpu.iota {dimensions = array<i32: 0>} : vector<8x128xi32>
    %c0_i32_22 = arith.constant 0 : i32
    %86 = vector.broadcast %c0_i32_22 : i32 to vector<8x128xi32>
    %87 = arith.cmpi eq, %84, %86 : vector<8x128xi32>
    %c1_i32 = arith.constant 1 : i32
    %88 = vector.broadcast %c1_i32 : i32 to vector<8x128xi32>
    %89 = arith.cmpi eq, %84, %88 : vector<8x128xi32>
    %c2_i32 = arith.constant 2 : i32
    %90 = vector.broadcast %c2_i32 : i32 to vector<8x128xi32>
    %91 = arith.cmpi eq, %84, %90 : vector<8x128xi32>
    %c3_i32 = arith.constant 3 : i32
    %92 = vector.broadcast %c3_i32 : i32 to vector<8x128xi32>
    %93 = arith.cmpi eq, %84, %92 : vector<8x128xi32>
    %c4_i32 = arith.constant 4 : i32
    %94 = vector.broadcast %c4_i32 : i32 to vector<8x128xi32>
    %95 = arith.cmpi eq, %84, %94 : vector<8x128xi32>
    %cst_23 = arith.constant 0.000000e+00 : f32
    %96 = vector.broadcast %80 : f32 to vector<8x128xf32>
    %97 = vector.broadcast %cst_23 : f32 to vector<8x128xf32>
    %98 = arith.select %95, %96, %97 : vector<8x128xi1>, vector<8x128xf32>
    %99 = vector.broadcast %71 : f32 to vector<8x128xf32>
    %100 = arith.select %93, %99, %98 : vector<8x128xi1>, vector<8x128xf32>
    %101 = vector.broadcast %83 : f32 to vector<8x128xf32>
    %102 = arith.select %91, %101, %100 : vector<8x128xi1>, vector<8x128xf32>
    %103 = vector.broadcast %67 : f32 to vector<8x128xf32>
    %104 = arith.select %89, %103, %102 : vector<8x128xi1>, vector<8x128xf32>
    %105 = vector.broadcast %53 : f32 to vector<8x128xf32>
    %106 = arith.select %87, %105, %104 : vector<8x128xi1>, vector<8x128xf32>
    %c0_i32_24 = arith.constant 0 : i32
    %107 = vector.broadcast %c0_i32_24 : i32 to vector<8x128xi32>
    %108 = arith.cmpi eq, %85, %107 : vector<8x128xi32>
    %cst_25 = arith.constant 0.000000e+00 : f32
    %109 = vector.broadcast %cst_25 : f32 to vector<8x128xf32>
    %110 = arith.select %108, %106, %109 : vector<8x128xi1>, vector<8x128xf32>
    %c0_26 = arith.constant 0 : index
    %c0_27 = arith.constant 0 : index
    %111 = vector.load %arg4[%c0_26, %c0_27] : memref<8x128xf32, #tpu.memory_space<vmem>>, vector<8x128xf32>
    tpu.vector_store %arg4[%c0_26, %c0_27], %110 {strides = array<i32>} : memref<8x128xf32, #tpu.memory_space<vmem>>, vector<8x128xf32>,
    return
  }
  func.func @transform_0(%arg0: i32) -> (i32, i32) {
    %c0_i32 = arith.constant 0 : i32
    %c0_i32_0 = arith.constant 0 : i32
    return %arg0, %c0_i32 : i32, i32
  }
  func.func @transform_1(%arg0: i32) -> (i32, i32) {
    %c0_i32 = arith.constant 0 : i32
    %c0_i32_0 = arith.constant 0 : i32
    return %arg0, %c0_i32 : i32, i32
  }
  func.func @transform_2(%arg0: i32) -> (i32, i32) {
    %c0_i32 = arith.constant 0 : i32
    %c0_i32_0 = arith.constant 0 : i32
    return %arg0, %c0_i32 : i32, i32
  }
  func.func @transform_3(%arg0: i32) -> (i32, i32) {
    %c0_i32 = arith.constant 0 : i32
    %c0_i32_0 = arith.constant 0 : i32
    return %arg0, %c0_i32 : i32, i32
  }
}

</mosaic_0001>

<bundles_post_ra>
// kernel: _lambda_.1
= control target key start
LH: loop header
LB: loop body
LE: loop exit
PB: predicated region body
PF: predicated region fallthrough
CT: control target
= control target key end

     0   :  { %8 = vsyncpa [#allocation3], 0  ;;  %s1162_s0 = inlined_call_operand.hbm [shape: f32[20,256], index: 0, kind: input, shape index: {}]   ;;  %s1163_s1 = inlined_call_operand.hbm [shape: f32[20,256], index: 1, kind: input, shape index: {}]   ;;  %s1164_s2 = inlined_call_operand.vmem [shape: s32[20,1], index: 2, kind: input, shape index: {}]   ;;  %s1165_s3 = inlined_call_operand.vmem [shape: f32[16,128], index: 3, kind: output, shape index: {}]  }
   0x1   :  { %10 = vsyncpa [#allocation3 + $0x1], 0 }
   0x2   :  { %11 = vsyncpa [#allocation5], 0 }
   0x3   :  { %13 = vsyncpa [#allocation5 + $0x1], 0  ;;  %s900_s12 = smov 0   ;;  %s902_s13 = smov 0  }
   0x4   :  { %s904_s14 = smov 0   ;;  %s906_s15 = smov 0  }
   0x5 LB: > { %s919_s16 = sadd.s32 4294967295, %s870_s15   ;;  %s922_s17 = sadd.s32 1, %s870_s15   ;;  %s870_s15 = sphi %s906_s15, %s1171_s15   ;;  %s866_s14 = sphi %s904_s14, %s1170_s14   ;;  %s862_s13 = sphi %s902_s13, %s1169_s13   ;;  %s858_s12 = sphi %s900_s12, %s1168_s12  }
   0x6   : > { %s23_s18 = ssub.s32 %s870_s15, %s922_s17  ;;  %s26_s19 = sadd.s32 1, %s866_s14 }
   0x7   : > { %p24_p0 = scmp.eq.s32.totalorder %s23_s18, 0  ;;  %p33_p1 = scmp.ne.s32.totalorder %s866_s14, %s862_s13 }
   0x8   : > { %p34_p2 = scmp.eq.s32.totalorder %s870_s15, 0  ;;  %p39_p3 = scmp.ne.s32.totalorder %s862_s13, %s858_s12 }
   0x9   : > { %s932_s20 = scalar_select %p24_p0, %s866_s14, %s26_s19  }
   0xa   : > { %p934_p4 = por %p34_p2, %p33_p1  ;;  %p40_p5 = scmp.eq.s32.totalorder %s919_s16, 0 }
   0xb   : > { %p655_p7 = scmp.ge.s32.totalorder %s870_s15, 2 }
   0xc   : > { %p939_p6 = por %p40_p5, %p39_p3 }
   0xd   : > { %137 = sbr.rel (%p655_p7) target bundleno = 90 (0x5a), region = 16 }
  0x14   : > { %140 = sbr.rel (!%p934_p4) target bundleno = 55 (0x37), region = 20  ;;  %s141_s23 = sand.u32 (%p934_p4), 1, %s866_s14  }
  0x15   : > { %s657_s24 = sshll.u32 (%p934_p4), %s870_s15, 1  ;;  %s656_s25 = sshll.u32 (%p934_p4), %s141_s23, 5 }
  0x16   : > { %s147_s26 = ssub.s32 (%p934_p4), 3, %s657_s24  ;;  %s951_s29 = scalar_lea.sflag (%p934_p4), [#allocation3], %s141_s23 }
  0x17   : > { %p148_p8 = scmp.lt.s32.totalorder (%p934_p4), %s147_s26, 2  ;;  %s145_s30 = scalar_lea.vmem (%p934_p4), [#allocation2], %s656_s25 }
  0x1b   : > { %s1173_s26 = smov (!%p148_p8, %s147_s26), 2 }
  0x1c   : > { %s948_s27 = sshll.u32 %s1173_s26, 8 }
  0x1d   : > { %s153_s28 = ssub.s32 512, %s948_s27 }
  0x1e   : > { %154 = vsyncadd %s951_s29, %s153_s28  ;;  %p660_p9 = scmp.ne.s32.totalorder %s948_s27, 0  ;;  %s701_s4 = sshll.u32 %s870_s15, 9 }
  0x1f   : > { %s959_s7 = scalar_lea.hbm %s1162_s0, %s701_s4  ;;  %s160_s8 = sshll.u32 %s145_s30, 4  ;;  %s961_s8 = int_to_ptr.vmem [resolvable:$true] %s160_s8 }
  0x20   : > { %s776_s9 = scalar_lea.hbm %s959_s7, %s948_s27  ;;  %s780_s12 = scalar_lea.hbm %s1162_s0, 768 }
  0x21   : > { %p777_p10 = scmp.ne.s32.totalorder %s959_s7, %s776_s9  ;;  %p781_p13 = scmp.lt.u32.totalorder %s959_s7, %s1162_s0 }
  0x22   : > { %p782_p0 = scmp.lt.u32.totalorder %s780_s12, %s776_s9  ;;  %p784_p2 = scmp.lt.u32.totalorder %s776_s9, %s959_s7 }
  0x23   : > { %p778_p11 = pnand %p777_p10, %p660_p9 }
  0x24   : > { %p783_p1 = por %p782_p0, %p781_p13 }
  0x25   : > { %p779_p12 = pneg %p778_p11 }
  0x26   : > { %p785_p3 = por %p784_p2, %p783_p1 }
  0x28   : > { %p786_p5 = pnand %p785_p3, %p779_p12 }
  0x2a   : > { %789 = shalt.err (!%p786_p5)
}
  0x2b   : > { %s790_s23 = scalar_lea.vmem %s961_s8, %s948_s27  ;;  %s872_s24 = smov [#allocation2]  }
  0x2c   : > { %p791_p7 = scmp.ne.s32.totalorder %s961_s8, %s790_s23  ;;  %s794_s25 = sshll.u32 %s872_s24, 4  ;;  %s795_s25 = int_to_ptr.vmem [resolvable:$false] %s794_s25 }
  0x2d   : > { %s796_s26 = scalar_lea.vmem %s795_s25, 1024  ;;  %p797_p11 = scmp.lt.s32.totalorder %s961_s8, %s795_s25 }
  0x2e   : > { %p792_p8 = pnand %p791_p7, %p660_p9  ;;  %p798_p13 = scmp.lt.s32.totalorder %s796_s26, %s790_s23 }
  0x30   : > { %p793_p10 = pneg %p792_p8  ;;  %p799_p0 = por %p798_p13, %p797_p11 }
  0x32   : > { %p800_p1 = pnand %p799_p0, %p793_p10 }
  0x34   : > { %803 = shalt.err (!%p800_p1)
}
  0x35   : > { %s873_s28 = smov 256   ;;  %s874_s30 = smov 16  }
  0x36   : > { %166 = dma.hbm_to_vmem [thread:$0]  (%p660_p9), %s959_s7, %s948_s27, %s961_s8, %s951_s29, %s873_s28, %s873_s28, %s874_s30  }
  0x37 PF: > { %169 = sbr.rel (!%p934_p4) target bundleno = 90 (0x5a), region = 24  ;;  %s170_s4 = sand.u32 (%p934_p4), 1, %s866_s14  }
  0x38   : > { %s666_s5 = sshll.u32 (%p934_p4), %s870_s15, 1  ;;  %s665_s6 = sshll.u32 (%p934_p4), %s170_s4, 5 }
  0x39   : > { %s176_s9 = ssub.s32 (%p934_p4), 3, %s666_s5  ;;  %s995_s12 = scalar_lea.sflag (%p934_p4), [#allocation5], %s170_s4 }
  0x3a   : > { %p177_p12 = scmp.lt.s32.totalorder (%p934_p4), %s176_s9, 2  ;;  %s174_s27 = scalar_lea.vmem (%p934_p4), [#allocation4], %s665_s6 }
  0x3e   : > { %s1175_s9 = smov (!%p177_p12, %s176_s9), 2 }
  0x3f   : > { %s992_s10 = sshll.u32 %s1175_s9, 8 }
  0x40   : > { %s182_s11 = ssub.s32 512, %s992_s10 }
  0x41   : > { %183 = vsyncadd %s995_s12, %s182_s11  ;;  %p669_p4 = scmp.ne.s32.totalorder %s992_s10, 0  ;;  %s704_s21 = sshll.u32 %s870_s15, 9 }
  0x42   : > { %s1003_s8 = scalar_lea.hbm %s1163_s1, %s704_s21  ;;  %s189_s18 = sshll.u32 %s174_s27, 4  ;;  %s1005_s18 = int_to_ptr.vmem [resolvable:$true] %s189_s18 }
  0x43   : > { %s804_s19 = scalar_lea.hbm %s1003_s8, %s992_s10  ;;  %s808_s25 = scalar_lea.hbm %s1163_s1, 768 }
  0x44   : > { %p805_p9 = scmp.ne.s32.totalorder %s1003_s8, %s804_s19  ;;  %p809_p5 = scmp.lt.u32.totalorder %s1003_s8, %s1163_s1 }
  0x45   : > { %p810_p7 = scmp.lt.u32.totalorder %s808_s25, %s804_s19  ;;  %p812_p10 = scmp.lt.u32.totalorder %s804_s19, %s1003_s8 }
  0x46   : > { %p806_p2 = pnand %p805_p9, %p669_p4 }
  0x47   : > { %p811_p8 = por %p810_p7, %p809_p5 }
  0x48   : > { %p807_p3 = pneg %p806_p2 }
  0x49   : > { %p813_p11 = por %p812_p10, %p811_p8 }
  0x4b   : > { %p814_p13 = pnand %p813_p11, %p807_p3 }
  0x4d   : > { %817 = shalt.err (!%p814_p13)
}
  0x4e   : > { %s818_s30 = scalar_lea.vmem %s1005_s18, %s992_s10  ;;  %s875_s4 = smov [#allocation4]  }
  0x4f   : > { %p819_p0 = scmp.ne.s32.totalorder %s1005_s18, %s818_s30  ;;  %s822_s5 = sshll.u32 %s875_s4, 4  ;;  %s823_s5 = int_to_ptr.vmem [resolvable:$false] %s822_s5 }
  0x50   : > { %s824_s6 = scalar_lea.vmem %s823_s5, 1024  ;;  %p825_p9 = scmp.lt.s32.totalorder %s1005_s18, %s823_s5 }
  0x51   : > { %p820_p1 = pnand %p819_p0, %p669_p4  ;;  %p826_p2 = scmp.lt.s32.totalorder %s824_s6, %s818_s30 }
  0x53   : > { %p821_p12 = pneg %p820_p1  ;;  %p827_p5 = por %p826_p2, %p825_p9 }
  0x55   : > { %p828_p7 = pnand %p827_p5, %p821_p12 }
  0x57   : > { %831 = shalt.err (!%p828_p7)
}
  0x58   : > { %s876_s9 = smov 256   ;;  %s877_s11 = smov 16  }
  0x59   : > { %195 = dma.hbm_to_vmem [thread:$0]  (%p669_p4), %s1003_s8, %s992_s10, %s1005_s18, %s995_s12, %s876_s9, %s876_s9, %s877_s11  }
  0x5a PF: > { %p674_p3 = scmp.ge.s32.totalorder %s870_s15, 1  ;;  %p214_p8 = scmp.lt.s32.totalorder %s870_s15, 3 }
  0x5c   : > { %p215_p10 = pnand %p674_p3, %p214_p8 }
  0x5d   : > { %s220_s27 = sand.u32 (!%p215_p10), 1, %s862_s13  }
  0x5e   : > { %218 = sbr.rel (%p215_p10) target bundleno = 616 (0x268), region = 32  ;;  %s675_s21 = sshll.u32 (!%p215_p10), %s220_s27, 5 }
  0x5f   : > { %s221_s29 = scalar_lea.sflag (!%p215_p10), [#allocation3], %s220_s27  ;;  %s224_s7 = scalar_lea.vmem (!%p215_p10), [#allocation2], %s675_s21 }
  0x65   : > { %849 = dma.done.wait (%p939_p6), %s221_s29, 512  }
  0x66   : > { %851 = vsyncadd (%p939_p6), %s221_s29, 4294966784  ;;  %s230_s10 = scalar_lea.sflag [#allocation5], %s220_s27  ;;  %s1039_s12 = scalar_lea.vmem [#allocation4], %s675_s21 }
  0x67   : > { %853 = dma.done.wait (%p939_p6), %s230_s10, 512  }
  0x68   : > { %855 = vsyncadd (%p939_p6), %s230_s10, 4294966784  ;;  %s677_s15 = sshll.u32 %s919_s16, 1  ;;  %v878_v0 = vmov 0   ;;  %v299_v3 = vld [vmem:[%s224_s7] sm:$0xff]  ;;  %v300_v4 = vld [vmem:[%s224_s7 + $0x8] sm:$0xff]  ;;  %s680_s22 = sshll.u32 %s919_s16, 4  ;;  %v310_v33 = vlaneseq }
  0x69   : > { %755 = vset.pattern.permute.xlu0 %v878_v0  ;;  %p286_p4 = scmp.lt.s32.totalorder %s677_s15, 2  ;;  %v301_v5 = vld [vmem:[%s224_s7 + $0x10] sm:$0xff]  ;;  %v318_v6 = vand.u32 2147483647, %v299_v3  ;;  %v319_v7 = vand.u32 2147483647, %v300_v4  ;;  %v313_v47 = vstv %s680_s22 }
  0x6a   : > { %v302_v8 = vld [vmem:[%s224_s7 + $0x18] sm:$0xff]  ;;  %v320_v9 = vand.u32 2147483647, %v301_v5  ;;  %v1072_v25 = vld [vmem:[%s1039_s12] sm:$0xff]  ;;  %v1075_v26 = vld [vmem:[%s1039_s12 + $0x8] sm:$0xff]  ;;  %v1084_v46 = vshrl.u32 %v310_v33, 7 }
  0x6b   : > { %s1177_s15 = smov (!%p286_p4, %s677_s15), 2  ;;  %vm322_vm0 = vcmp.lt.f32.partialorder %v318_v6, inf  ;;  %vm323_vm1 = vcmp.lt.f32.partialorder %v319_v7, inf  ;;  %v321_v10 = vand.u32 2147483647, %v302_v8  ;;  %v305_v34 = vld [vmem:[%s1039_s12 + $0x10] sm:$0xff] }
  0x6c   : > { %s678_s8 = sshll.u32 %s1177_s15, 3  ;;  %vm324_vm2 = vcmp.lt.f32.partialorder %v320_v9, inf  ;;  %v1055_v11 = vsel %vm322_vm0, %v299_v3, 0.0  ;;  %v1057_v12 = vsel %vm323_vm1, %v300_v4, 0.0  ;;  %v1080_v35 = vld [vmem:[%s1039_s12 + $0x18] sm:$0xff]  ;;  %v391_v36 = vsub.f32 1.0, %v1072_v25 }
  0x6d   : > { %s289_s23 = scalar_lea.vmem %s1164_s2, %s678_s8  ;;  %vm325_vm3 = vcmp.lt.f32.partialorder %v321_v10, inf  ;;  %v1059_v13 = vsel %vm324_vm2, %v301_v5, 0.0  ;;  %v371_v14 = vsub.f32 1.0, %v1055_v11  ;;  %v372_v15 = vsub.f32 1.0, %v1057_v12  ;;  %p295_p6 = scmp.lt.s32.totalorder %s919_s16, 1 }
  0x6e   : > { %v1049_v1 = vld [vmem:[%s289_s23] sm:$0xff]  ;;  %v1052_v2 = vld [vmem:[%s289_s23 + $0x8] sm:$0xff]  ;;  %756 = vlog2.f32 %v1055_v11  ;;  %v1064_v16 = vsel %vm325_vm3, %v302_v8, 0.0  ;;  %v373_v17 = vsub.f32 1.0, %v1059_v13  ;;  %v392_v37 = vsub.f32 1.0, %v1075_v26 }
  0x6f   : > { %334 = vperm.xlu0 %755, %v1049_v1   ;;  %758 = vlog2.f32 %v1057_v12  ;;  %v374_v18 = vsub.f32 1.0, %v1064_v16  ;;  %v393_v48 = vsub.f32 1.0, %v305_v34  ;;  %v394_v49 = vsub.f32 1.0, %v1080_v35  ;;  %s1179_s16 = smov (!%p295_p6, %s919_s16), 1 }
  0x70   : > { %760 = vlog2.f32 %v371_v14  ;;  %v1089_v58 = vand.u32 127, %v310_v33  ;;  %v312_v59 = vadd.s32 8, %v1084_v46  ;;  %v1093_v60 = vadd.s32 %v313_v47, %v1084_v46  ;;  %s679_s9 = sshll.u32 %s1179_s16, 3 }
  0x71   : > { %762 = vlog2.f32 %v372_v15  ;;  %vm411_vm4 = vcmp.gt.s32.totalorder %v1049_v1, 0  ;;  %vm413_vm6 = vcmp.gt.s32.totalorder %v1052_v2, 0  ;;  %vm460_vm7 = vcmp.gt.f32.partialorder %v1072_v25, 0.0  ;;  %s298_s21 = scalar_lea.vmem %s1165_s3, %s679_s9 }
  0x72   : > { %764 = vlog2.f32 %v1059_v13  ;;  %v332_v5 = vadd.s32 128, %v1089_v58  ;;  %v1098_v6 = vadd.s32 %v313_v47, %v312_v59  ;;  %vm316_vm5 = vcmp.lt.s32.totalorder %v1093_v60, 20 }
  0x73   : > { %337 = vperm.xlu0 %755, %v1052_v2   ;;  %766 = vlog2.f32 %v373_v17  ;;  %vm462_vm8 = vcmp.gt.f32.partialorder %v305_v34, 0.0  ;;  %vm461_vm9 = vcmp.gt.f32.partialorder %v1075_v26, 0.0  ;;  %v412_v9 = vsel %vm411_vm4, %v1049_v1, 0 }
  0x74   : > { %768 = vlog2.f32 %v1064_v16  ;;  %vm448_vm10 = vcmp.gt.f32.partialorder %v1055_v11, 0.5  ;;  %vm317_vm13 = vcmp.lt.s32.totalorder %v1098_v6, 20  ;;  %v879_v17 = vmov 0.0  }
  0x75   : > { %770 = vlog2.f32 %v374_v18  ;;  %v693_v18 = vsel %vm460_vm7, 1.0, %v879_v17  ;;  %vm463_vm14 = vcmp.gt.f32.partialorder %v1080_v35, 0.0  ;;  %vm449_vm0 = vcmp.gt.f32.partialorder %v1057_v12, 0.5 }
  0x76   : > { %v694_v1 = vsel %vm461_vm9, 1.0, %v879_v17  ;;  %vm450_vm7 = vcmp.gt.f32.partialorder %v1059_v13, 0.5  ;;  %v414_v33 = vsel %vm413_vm6, %v1052_v2, 0  ;;  %vm451_vm9 = vcmp.gt.f32.partialorder %v1064_v16, 0.5 }
  0x77   : > { %vm435_vm6 = vcmask 7168  }
  0x78   : > { %v757_v19 = vpop.eup %756 }
  0x79   : > { %v759_v20 = vpop.eup %758  ;;  %v360_v27 = vmul.f32 0.6931472, %v757_v19  ;;  %v695_v19 = vsel %vm462_vm8, 1.0, %v879_v17 }
  0x7a   : > { %v761_v21 = vpop.eup %760  ;;  %v362_v30 = vmul.f32 0.6931472, %v759_v20 }
  0x7b   : > { %v763_v22 = vpop.eup %762  ;;  %v376_v28 = vmul.f32 0.6931472, %v761_v21  ;;  %v367_v38 = vmax.f32 %v360_v27, -100.0  ;;  %v689_v21 = vsel %vm448_vm10, 1.0, %v879_v17  ;;  %vm415_vm10 = vcmp.lt.s32.totalorder %v412_v9, 256 }
  0x7c   : > { %v765_v23 = vpop.eup %764  ;;  %v378_v31 = vmul.f32 0.6931472, %v763_v22  ;;  %v368_v42 = vmax.f32 %v362_v30, -100.0 }
  0x7d   : > { %v767_v24 = vpop.eup %766  ;;  %v383_v39 = vmax.f32 %v376_v28, -100.0  ;;  %v364_v40 = vmul.f32 0.6931472, %v765_v23  ;;  %v387_v50 = vmul.f32 %v367_v38, %v1072_v25 }
  0x7e   : > { %v769_v29 = vpop.eup %768  ;;  %v380_v41 = vmul.f32 0.6931472, %v767_v24  ;;  %v384_v43 = vmax.f32 %v378_v31, -100.0  ;;  %v388_v54 = vmul.f32 %v368_v42, %v1075_v26  ;;  %v696_v26 = vsel %vm463_vm14, 1.0, %v879_v17 }
  0x7f   : > { %v771_v32 = vpop.eup %770  ;;  %v366_v44 = vmul.f32 0.6931472, %v769_v29  ;;  %v395_v51 = vmul.f32 %v391_v36, %v383_v39  ;;  %v369_v52 = vmax.f32 %v364_v40, -100.0  ;;  %v690_v31 = vsel %vm449_vm0, 1.0, %v879_v17 }
  0x80   : > { %v382_v45 = vmul.f32 0.6931472, %v771_v32  ;;  %v385_v53 = vmax.f32 %v380_v41, -100.0  ;;  %v396_v55 = vmul.f32 %v392_v37, %v384_v43  ;;  %v692_v43 = vsel %vm451_vm9, 1.0, %v879_v17 }
  0x81   : > { %v370_v56 = vmax.f32 %v366_v44, -100.0  ;;  %v399_v61 = vadd.f32 %v395_v51, %v387_v50  ;;  %v389_v62 = vmul.f32 %v369_v52, %v305_v34  ;;  %vm536_vm14 = vcmp.eq.s32.totalorder %v1089_v58, 1 }
  0x82   : > { %v386_v57 = vmax.f32 %v382_v45, -100.0  ;;  %v397_v63 = vmul.f32 %v393_v48, %v385_v53  ;;  %v400_v0 = vadd.f32 %v396_v55, %v388_v54  ;;  %vm550_vm0 = vcmp.eq.s32.totalorder %v1084_v46, 0 }
  0x83   : > { %v390_v3 = vmul.f32 %v370_v56, %v1080_v35  ;;  %v403_v7 = vsub.f32 0.0, %v399_v61  ;;  %v691_v35 = vsel %vm450_vm7, 1.0, %v879_v17 }
  0x84   : > { %v398_v4 = vmul.f32 %v394_v49, %v386_v57  ;;  %v401_v8 = vadd.f32 %v397_v63, %v389_v62  ;;  %v404_v14 = vsub.f32 0.0, %v400_v0  ;;  %v416_v49 = vsel %vm415_vm10, %v412_v9, 256 }
  0x85   : > { %v685_v54 = vcvt.s32.f32 %v416_v49 }
  0x86   : > { %v402_v15 = vadd.f32 %v398_v4, %v390_v3  ;;  %v405_v22 = vsub.f32 0.0, %v401_v8 }
  0x87   : > { %v686_v61 = vsel %vm316_vm5, %v685_v54, 0.0 }
  0x88   : > { %v406_v28 = vsub.f32 0.0, %v402_v15  ;;  %v520_v0 = vsel %vm435_vm6, %v686_v61, 0.0 }
  0xee   : > { %v335_v10 = vpop.permute.xlu0 %334 }
  0xef   : > { %vm339_vm11 = vcmp.lt.s32.totalorder %v1089_v58, %v335_v10  ;;  %vm340_vm12 = vcmp.lt.s32.totalorder %v332_v5, %v335_v10 }
  0xf0   : > { %vm347_vm15 = vmand %vm339_vm11, %vm316_vm5  ;;  %vm417_vm11 = vcmp.lt.s32.totalorder %v414_v33, 256 }
  0xf1   : > { %vm348_vm1 = vmand %vm340_vm12, %vm316_vm5  ;;  %v681_v11 = vsel %vm347_vm15, 1.0, %v879_v17  ;;  %v407_v20 = vsel %vm347_vm15, %v403_v7, 0.0  ;;  %v418_v50 = vsel %vm417_vm11, %v414_v33, 256  ;;  %vm539_vm5 = vcmp.eq.s32.totalorder %v1089_v58, 4 }
  0xf2   : > { %v338_v23 = vpop.permute.xlu0 %337  ;;  %v682_v24 = vsel %vm348_vm1, 1.0, %v879_v17  ;;  %v408_v25 = vsel %vm348_vm1, %v404_v14, 0.0  ;;  %v472_v27 = vmul.f32 %v693_v18, %v681_v11  ;;  %v504_v2 = vmul.f32 %v689_v21, %v681_v11 }
  0xf3   : > { %vm341_vm2 = vcmp.lt.s32.totalorder %v1089_v58, %v338_v23  ;;  %vm342_vm3 = vcmp.lt.s32.totalorder %v332_v5, %v338_v23  ;;  %v423_v29 = vadd.f32 %v408_v25, %v407_v20  ;;  %v473_v30 = vmul.f32 %v694_v1, %v682_v24 }
  0xf4   : > { %vm349_vm4 = vmand %vm341_vm2, %vm317_vm13  ;;  %v476_v32 = vmul.f32 %v689_v21, %v472_v27  ;;  %v505_v44 = vmul.f32 %v690_v31, %v682_v24  ;;  %v687_v55 = vcvt.s32.f32 %v418_v50  ;;  %v429_v5 = vmax.f32 %v686_v61, 1.0 }
  0xf5   : > { %vm350_vm8 = vmand %vm342_vm3, %vm317_vm13  ;;  %v683_v34 = vsel %vm349_vm4, 1.0, %v879_v17  ;;  %v477_v36 = vmul.f32 %v690_v31, %v473_v30  ;;  %424 = vadd.xlane.f32.xlu1 %v423_v29  ;;  %v409_v37 = vsel %vm349_vm4, %v405_v22, 0.0  ;;  %v492_v48 = vadd.f32 %v473_v30, %v472_v27 }
  0xf6   : > { %v684_v38 = vsel %vm350_vm8, 1.0, %v879_v17  ;;  %v474_v13 = vmul.f32 %v695_v19, %v683_v34  ;;  %v410_v39 = vsel %vm350_vm8, %v406_v28, 0.0  ;;  %v506_v51 = vmul.f32 %v691_v35, %v683_v34 }
  0xf7   : > { %v475_v12 = vmul.f32 %v696_v26, %v684_v38  ;;  %v426_v40 = vadd.f32 %v410_v39, %v409_v37  ;;  %v480_v42 = vadd.f32 %v477_v36, %v476_v32  ;;  %v508_v16 = vadd.f32 %v505_v44, %v504_v2 }
  0xf8   : > { %v478_v41 = vmul.f32 %v691_v35, %v474_v13  ;;  %v493_v53 = vadd.f32 %v492_v48, %v474_v13  ;;  %v507_v59 = vmul.f32 %v692_v43, %v684_v38  ;;  %v688_v62 = vsel %vm317_vm13, %v687_v55, 0.0 }
  0xf9   : > { %427 = vadd.xlane.f32.xlu1 %v426_v40  ;;  %v479_v45 = vmul.f32 %v692_v43, %v475_v12  ;;  %v509_v57 = vadd.f32 %v508_v16, %v506_v51  ;;  %v521_v3 = vsel %vm435_vm6, %v688_v62, 0.0  ;;  %v430_v7 = vmax.f32 %v688_v62, 1.0 }
  0xfa   : > { %v481_v47 = vadd.f32 %v480_v42, %v478_v41  ;;  %v494_v56 = vadd.f32 %v493_v53, %v475_v12  ;;  %v522_v4 = vadd.f32 %v521_v3, %v520_v0  ;;  %772 = vrcp.f32 %v429_v5 }
  0xfb   : > { %v510_v63 = vadd.f32 %v509_v57, %v507_v59  ;;  %774 = vrcp.f32 %v430_v7  ;;  %vm538_vm12 = vcmp.eq.s32.totalorder %v1089_v58, 3  ;;  %vm537_vm13 = vcmp.eq.s32.totalorder %v1089_v58, 2 }
  0xfc   : > { %v482_v52 = vadd.f32 %v481_v47, %v479_v45  ;;  %vm535_vm15 = vcmp.eq.s32.totalorder %v1089_v58, 0 }
  0xfe   : > { %483 = vadd.xlane.f32.xlu1 %v482_v52 }
 0x102   : > { %495 = vadd.xlane.f32.xlu1 %v494_v56 }
 0x104   : > { %v773_v8 = vpop.eup %772 }
 0x105   : > { %v775_v60 = vpop.eup %774 }
 0x106   : > { %511 = vadd.xlane.f32.xlu1 %v510_v63 }
 0x10a   : > { %523 = vadd.xlane.f32.xlu1 %v522_v4 }
 0x182   : > { %v425_v9 = vpop.xlane.xlu1 %424 }
 0x183   : > { %v432_v10 = vmul.f32 %v773_v8, %v425_v9 }
 0x185   : > { %v436_v15 = vsel %vm435_vm6, %v432_v10, 0.0 }
 0x186   : > { %v428_v14 = vpop.xlane.xlu1 %427 }
 0x187   : > { %v434_v6 = vmul.f32 %v775_v60, %v428_v14 }
 0x189   : > { %v437_v17 = vsel %vm435_vm6, %v434_v6, 0.0 }
 0x18a   : > { %v438_v18 = vadd.f32 %v437_v17, %v436_v15 }
 0x18b   : > { %v484_v19 = vpop.xlane.xlu1 %483 }
 0x18c   : > { %439 = vadd.xlane.f32.xlu0 %v438_v18  ;;  %v485_v20 = vrot.slane %v484_v19, 4 }
 0x18e   : > { %v486_v25 = vadd.f32 %v485_v20, %v484_v19 }
 0x18f   : > { %v496_v1 = vpop.xlane.xlu1 %495 }
 0x190   : > { %v497_v22 = vrot.slane %v496_v1, 4  ;;  %v487_v30 = vrot.slane %v486_v25, 2 }
 0x192   : > { %v498_v27 = vadd.f32 %v497_v22, %v496_v1  ;;  %v488_v37 = vadd.f32 %v487_v30, %v486_v25 }
 0x193   : > { %v512_v11 = vpop.xlane.xlu1 %511 }
 0x194   : > { %v513_v23 = vrot.slane %v512_v11, 4  ;;  %v499_v31 = vrot.slane %v498_v27, 2  ;;  %v489_v40 = vrot.slane %v488_v37, 1 }
 0x196   : > { %v514_v28 = vadd.f32 %v513_v23, %v512_v11  ;;  %v500_v13 = vadd.f32 %v499_v31, %v498_v27  ;;  %v490_v45 = vadd.f32 %v489_v40, %v488_v37 }
 0x197   : > { %v524_v21 = vpop.xlane.xlu1 %523 }
 0x198   : > { %v525_v24 = vrot.slane %v524_v21, 4  ;;  %v515_v33 = vrot.slane %v514_v28, 2  ;;  %v501_v42 = vrot.slane %v500_v13, 1 }
 0x19a   : > { %v526_v29 = vadd.f32 %v525_v24, %v524_v21  ;;  %v516_v39 = vadd.f32 %v515_v33, %v514_v28  ;;  %v502_v47 = vadd.f32 %v501_v42, %v500_v13 }
 0x19c   : > { %v527_v34 = vrot.slane %v526_v29, 2  ;;  %v517_v2 = vrot.slane %v516_v39, 1 }
 0x19e   : > { %v528_v35 = vadd.f32 %v527_v34, %v526_v29  ;;  %v518_v48 = vadd.f32 %v517_v2, %v516_v39 }
 0x1a0   : > { %v529_v44 = vrot.slane %v528_v35, 1 }
 0x1a2   : > { %v530_v49 = vadd.f32 %v529_v44, %v528_v35 }
 0x219   : > { %v440_v26 = vpop.xlane.xlu0 %439 }
 0x21a   : > { %v441_v32 = vrot.slane %v440_v26, 4 }
 0x21c   : > { %v442_v36 = vadd.f32 %v441_v32, %v440_v26 }
 0x21e   : > { %v443_v38 = vrot.slane %v442_v36, 2 }
 0x220   : > { %v444_v12 = vadd.f32 %v443_v38, %v442_v36 }
 0x222   : > { %v445_v41 = vrot.slane %v444_v12, 1 }
 0x224   : > { %v446_v43 = vadd.f32 %v445_v41, %v444_v12 }
 0x226   : > { %705 = vpush %v446_v43 }
 0x227   : > { %707 = vpush %v490_v45 }
 0x228   : > { %709 = vpush %v502_v47 }
 0x229   : > { %711 = vpush %v518_v48 }
 0x22a   : > { %713 = vpush %v530_v49 }
 0x257   : > { %s706_s24 = spop %705 }
 0x258   : > { %s708_s25 = spop %707  ;;  %v548_v56 = vstv %s706_s24 }
 0x259   : > { %s710_s26 = spop %709  ;;  %v546_v54 = vstv %s708_s25 }
 0x25a   : > { %s712_s28 = spop %711  ;;  %v542_v51 = vstv %s710_s26 }
 0x25b   : > { %s714_s30 = spop %713 }
 0x25c   : > { %s532_s4 = ssub.f32 %s714_s30, %s712_s28  ;;  %v540_v50 = vstv %s714_s30 }
 0x25d   : > { %v541_v52 = vsel %vm539_vm5, %v540_v50, 0.0 }
 0x25e   : > { %s533_s5 = ssub.f32 %s532_s4, %s710_s26  ;;  %v543_v53 = vsel %vm538_vm12, %v542_v51, %v541_v52 }
 0x260   : > { %s534_s6 = sadd.f32 %s708_s25, %s533_s5 }
 0x262   : > { %v544_v16 = vstv %s534_s6 }
 0x263   : > { %v545_v55 = vsel %vm537_vm13, %v544_v16, %v543_v53 }
 0x264   : > { %v547_v57 = vsel %vm536_vm14, %v546_v54, %v545_v55 }
 0x265   : > { %v549_v59 = vsel %vm535_vm15, %v548_v56, %v547_v57 }
 0x266   : > { %v551_v61 = vsel %vm550_vm0, %v549_v59, 0.0 }
 0x267   : > { %552 = vst [vmem:[%s298_s21] sm:$0xff] %v551_v61 }
 0x268 PF: > { %p16_p11 = scmp.ge.s32.totalorder %s922_s17, 4   ;;  %s1168_s12 = smov %s862_s13 }
 0x269   : > { %s1169_s13 = smov %s866_s14  ;;  %s1170_s14 = smov %s932_s20 }
 0x26a   : > { %s1171_s15 = smov %s922_s17  ;;  %18 = sbr.rel (!%p16_p11) target bundleno = 5 (0x5), region = 88 }
 0x271   :  { %572 = vsyncpa [#allocation3], 1 }
 0x272   :  { %574 = vsyncpa [#allocation3 + $0x1], 1 }
 0x273   :  { %575 = vsyncpa [#allocation5], 1 }
 0x274   :  { %577 = vsyncpa [#allocation5 + $0x1], 1 }

</bundles_post_ra>
